<compile_context>
chip_gen: v5e
topology: v5e:2x2
jax: 0.10.0
libtpu: 0.0.40
codegen_flags: <defaults>
</compile_context>

<pallas_src>
import jax
import jax.numpy as jnp
from jax import lax
from jax.experimental import pallas as pl
from jax.experimental.pallas import tpu as pltpu


# Vocabulary layout of the 8 embedding tables (x1..x5, z1..z3), stacked row-wise.
_VOCABS = [30, 20, 7, 13, 6, 2, 2, 3]
_VOCAB_OFFSETS = [sum(_VOCABS[:i]) for i in range(len(_VOCABS))]   # [0,30,50,57,70,76,78,80]
_TOTAL_VOCAB = sum(_VOCABS)                                        # 83


def s2s_kernel(x_att_ref, emb2_ref, w_in_ref, w_dec2_ref, vecs_ref, out_ref):
    B = x_att_ref.shape[0]
    V, E2 = emb2_ref.shape          # (83, 2E) block-structured table
    E = E2 // 2
    H = w_dec2_ref.shape[0] - E     # decoder hidden = 64
    O = w_dec2_ref.shape[1] // 2    # decoder output = 16
    OUT_W = out_ref.shape[1]

    # ---------- fused embedding lookup + sum: ONE multi-hot (B,83)@(83,2E) MXU pass ----------
    # x_att already carries global row ids (vocab offsets added in the wrapper), so the 8
    # columns hit 8 disjoint row ranges and a single multi-hot matrix reproduces gather+sum.
    idx = x_att_ref[...]                                                # (B, 8) int32
    viota = lax.broadcasted_iota(jnp.int32, (B, V), 1)                  # (B, V)
    onehot = jnp.zeros((B, V), jnp.float32)
    for c in range(8):
        # TODO(synk): at very large batch tiles this accumulation could be wrapped in a
        # lax.fori_loop(unroll=True) to bound vreg live ranges; tiles are capped at 1024 rows.
        onehot = onehot + (viota == idx[:, c:c + 1]).astype(jnp.float32)

    # HIGHEST precision so the one-hot (exactly bf16-representable) matmul reproduces the
    # exact f32 gather+add semantics of the PyTorch embeddings.
    xz = jnp.dot(onehot, emb2_ref[...],
                 precision=lax.Precision.HIGHEST,
                 preferred_element_type=jnp.float32)                    # (B, 2E)
    xsum = xz[:, :E]
    zsum = xz[:, E:2 * E]

    # ---------- packed weights: static zero-cost slices of the slabs ----------
    w_in = w_in_ref[...]                                                # (E, 2E+H)
    enc_w1 = w_in[:, :E]
    enc_w2 = w_in[:, E:2 * E]
    dec_w1 = w_in[:, 2 * E:2 * E + H]

    def row(r, n):
        return vecs_ref[r:r + 1, :n]                                    # (1, n) static slice

    def mm(a, w):
        # Default MXU precision (single pass).  Storage dtype comes from pack_params
        # (f32 default; bf16 on v6e/v7x halves weight bytes, both operands then bf16).
        return jnp.dot(a.astype(w.dtype), w, preferred_element_type=jnp.float32)

    def ln(h, g, b, eps=1e-5):
        # PyTorch nn.LayerNorm: biased variance over the last dim.
        mu = jnp.mean(h, axis=-1, keepdims=True)
        var = jnp.mean((h - mu) ** 2, axis=-1, keepdims=True)
        return (h - mu) * lax.rsqrt(var + eps) * g + b

    # ---------- encoder MLP (residual, in == out) ----------
    h = jnp.maximum(ln(mm(xsum, enc_w1) + row(0, E), row(1, E), row(2, E)), 0.0)
    h = ln(mm(h, enc_w2) + row(3, E), row(4, E), row(5, E))
    x_enc = jnp.maximum(h + xsum, 0.0)                                  # (B, E)

    ext = x_enc + zsum                                                  # emb_extended

    # ---------- decoder MLP (main + shortcut merged into one MXU pass) ----------
    h1 = jnp.maximum(ln(mm(ext, dec_w1) + row(6, H), row(7, H), row(8, H)), 0.0)   # (B, H)

    # [h1 | ext] @ blockdiag(dec_w2, dec_ws) -> [h1 @ dec_w2 | ext @ dec_ws]
    both = mm(jnp.concatenate([h1, ext], axis=-1), w_dec2_ref[...])     # (B, 2*O)
    main = ln(both[:, :O] + row(9, O), row(10, O), row(11, O))
    sc = ln(both[:, O:2 * O] + row(12, O), row(13, O), row(14, O))
    out16 = jnp.maximum(main + sc, 0.0)                                 # (B, 16)

    # ---------- final Linear(16, 1) as a lane reduction ----------
    wf = vecs_ref[15:16, :O]                                            # (1, 16)
    bf = vecs_ref[16:17, 0:1]                                           # (1, 1)
    pred = jnp.sum(out16 * wf, axis=-1, keepdims=True) + bf             # (B, 1)

    # ---------- single lane-dense output store: [x_enc | out16 | pred | pad] ----------
    pad_w = OUT_W - (E + O + 1)
    pieces = [x_enc, out16, pred]
    if pad_w > 0:
        pieces.append(jnp.zeros((B, pad_w), jnp.float32))
    out_ref[...] = jnp.concatenate(pieces, axis=-1)


@jax.jit
def s2s_forward(x_att, packed):
    """x_att: int32 (B, 8). Returns (pred (B,), outputs (B,16), x_enc (B,E))."""
    B = x_att.shape[0]
    E = packed["w_in"].shape[0]
    O = packed["w_dec2"].shape[1] // 2
    OUT_W = max(128, ((E + O + 1 + 127) // 128) * 128)   # lane-dense output width

    # Fold the vocab offsets into the indices here (one tiny XLA add), so the kernel
    # captures no array constants and does no per-tile offset add.
    offsets = jnp.asarray(_VOCAB_OFFSETS, jnp.int32)
    x_att_g = x_att.astype(jnp.int32) + offsets[None, :]

    # Batch tiling: one tile per call up to 512 rows; for larger B, big tiles (amortize the
    # ~0.35 us/step grid overhead) while keeping >= 2 grid steps so both v7x TensorCores
    # engage under dimension_semantics=("parallel",).
    if B <= 512:
        TB = max(8, ((B + 7) // 8) * 8)
    else:
        half = (B + 1) // 2
        TB = min(1024, ((half + 7) // 8) * 8)
    Bp = ((B + TB - 1) // TB) * TB
    if Bp != B:
        x_att_g = jnp.pad(x_att_g, ((0, Bp - B), (0, 0)))   # padded rows map to row 0, dropped later

    slab = pl.pallas_call(
        s2s_kernel,
        out_shape=jax.ShapeDtypeStruct((Bp, OUT_W), jnp.float32),
        grid=(Bp // TB,),
        in_specs=[
            pl.BlockSpec((TB, 8), lambda i: (i, 0)),                    # global indices (batch tiled)
            pl.BlockSpec(packed["emb2"].shape, lambda i: (0, 0)),       # block-structured (83, 2E) table
            pl.BlockSpec(packed["w_in"].shape, lambda i: (0, 0)),       # [enc_w1|enc_w2|dec_w1]
            pl.BlockSpec(packed["w_dec2"].shape, lambda i: (0, 0)),     # blockdiag(dec_w2, dec_ws)
            pl.BlockSpec(packed["vecs"].shape, lambda i: (0, 0)),       # all row-vector params, one slab
        ],
        out_specs=pl.BlockSpec((TB, OUT_W), lambda i: (i, 0)),
        compiler_params=pltpu.CompilerParams(
            dimension_semantics=("parallel",),
        ),
    )(x_att_g, packed["emb2"], packed["w_in"], packed["w_dec2"], packed["vecs"])

    slab = slab[:B]
    pred = slab[:, E + O]            # squeeze(1) like the PyTorch module
    outputs = slab[:, E:E + O]
    x_enc = slab[:, :E]
    return pred, outputs, x_enc


# ------------------------- parameter init (PyTorch layout) -------------------------
def _xavier_uniform(key, fan_in, fan_out):
    bound = (6.0 / (fan_in + fan_out)) ** 0.5
    return jax.random.uniform(key, (fan_in, fan_out), jnp.float32, -bound, bound)


def init_params(key, embed_size):
    E = embed_size
    keys = jax.random.split(key, 16)
    p = {}
    # embeddings ~ N(0, 0.01)
    vocabs_x = [30, 20, 7, 13, 6]
    for i, v in enumerate(vocabs_x):
        p[f"emb_x{i+1}"] = 0.01 * jax.random.normal(keys[i], (v, E), jnp.float32)
    vocabs_z = [2, 2, 3]
    for i, v in enumerate(vocabs_z):
        p[f"emb_z{i+1}"] = 0.01 * jax.random.normal(keys[5 + i], (v, E), jnp.float32)

    def ln_params(n):
        return jnp.ones((1, n), jnp.float32), jnp.zeros((1, n), jnp.float32)

    # encoder MLP: Linear(E,E) -> LN(E) -> ReLU -> Linear(E,E) -> LN(E) (+x) -> ReLU
    p["enc_w1"] = _xavier_uniform(keys[8], E, E)
    p["enc_b1"] = jnp.full((1, E), 0.01, jnp.float32)
    p["enc_g1"], p["enc_be1"] = ln_params(E)
    p["enc_w2"] = _xavier_uniform(keys[9], E, E)
    p["enc_b2"] = jnp.full((1, E), 0.01, jnp.float32)
    p["enc_g2"], p["enc_be2"] = ln_params(E)

    # decoder MLP: Linear(E,64) -> LN(64) -> ReLU -> Linear(64,16) -> LN(16)
    #              (+ shortcut Linear(E,16) -> LN(16)) -> ReLU
    p["dec_w1"] = _xavier_uniform(keys[10], E, 64)
    p["dec_b1"] = jnp.full((1, 64), 0.01, jnp.float32)
    p["dec_g1"], p["dec_be1"] = ln_params(64)
    p["dec_w2"] = _xavier_uniform(keys[11], 64, 16)
    p["dec_b2"] = jnp.full((1, 16), 0.01, jnp.float32)
    p["dec_g2"], p["dec_be2"] = ln_params(16)
    bound_s = (1.0 / E) ** 0.5
    p["dec_ws"] = jax.random.uniform(keys[12], (E, 16), jnp.float32, -bound_s, bound_s)
    p["dec_bs"] = jax.random.uniform(keys[13], (1, 16), jnp.float32, -bound_s, bound_s)
    p["dec_gs"], p["dec_bes"] = ln_params(16)

    # final head Linear(16, 1) — stored as a (1,16) row used in a lane reduction.
    bound_f = (1.0 / 16.0) ** 0.5
    p["wf"] = jax.random.uniform(keys[14], (1, 16), jnp.float32, -bound_f, bound_f)
    p["bf"] = jax.random.uniform(keys[15], (1, 1), jnp.float32, -bound_f, bound_f)
    return p


def pack_params(p, dtype=jnp.float32):
    """Pack the 22 parameter tensors into 4 contiguous slabs (done once, outside jit).

    dtype: storage dtype for the dense matmul weights. f32 (default) keeps f32 storage with
    default-precision MXU matmuls; jnp.bfloat16 halves weight bytes on v6e/v7x (both matmul
    operands then bf16). The embedding table always stays f32 so the gather+sum is exact.
    """
    E = p["enc_w1"].shape[0]
    H = p["dec_w1"].shape[1]
    O = p["dec_w2"].shape[1]
    assert E <= 128 and H <= 128 and O <= 128

    # Block-structured embedding table: x-rows fill lanes [0:E], z-rows fill lanes [E:2E].
    emb_x = jnp.concatenate([p[f"emb_x{i}"] for i in range(1, 6)], axis=0)   # (76, E)
    emb_z = jnp.concatenate([p[f"emb_z{i}"] for i in range(1, 4)], axis=0)   # (7, E)
    Vx, Vz = emb_x.shape[0], emb_z.shape[0]
    emb2 = jnp.zeros((Vx + Vz, 2 * E), jnp.float32)
    emb2 = emb2.at[:Vx, :E].set(emb_x)
    emb2 = emb2.at[Vx:, E:].set(emb_z)                                       # (83, 2E)

    w_in = jnp.concatenate([p["enc_w1"], p["enc_w2"], p["dec_w1"]], axis=1)  # (E, 2E+H)

    w_dec2 = jnp.concatenate([
        jnp.concatenate([p["dec_w2"], jnp.zeros((H, O), jnp.float32)], axis=1),
        jnp.concatenate([jnp.zeros((E, O), jnp.float32), p["dec_ws"]], axis=1),
    ], axis=0)                                                               # (H+E, 2*O)

    # All row-vector parameters merged into one lane-padded (24, 128) slab (one DMA).
    W = 128

    def pad_row(v):
        return jnp.pad(v, ((0, 0), (0, W - v.shape[1])))

    rows = [p["enc_b1"], p["enc_g1"], p["enc_be1"],
            p["enc_b2"], p["enc_g2"], p["enc_be2"],
            p["dec_b1"], p["dec_g1"], p["dec_be1"],
            p["dec_b2"], p["dec_g2"], p["dec_be2"],
            p["dec_bs"], p["dec_gs"], p["dec_bes"],
            p["wf"], jnp.broadcast_to(p["bf"], (1, O))]
    vecs = jnp.concatenate([pad_row(r) for r in rows], axis=0)               # (17, 128)
    vecs = jnp.pad(vecs, ((0, 24 - vecs.shape[0]), (0, 0)))                  # (24, 128)

    return {
        "emb2": emb2.astype(jnp.float32),   # keep f32: embedding sums stay exact
        "w_in": w_in.astype(dtype),
        "w_dec2": w_dec2.astype(dtype),
        "vecs": vecs.astype(jnp.float32),
    }


if __name__ == "__main__":
    B = 8
    EMBED = 32

    key = jax.random.PRNGKey(0)
    k_param, k_data = jax.random.split(key)
    params = init_params(k_param, EMBED)
    packed = pack_params(params, dtype=jnp.float32)   # jnp.bfloat16 for v6e/v7x MXU fast path

    # x_att columns: vocab sizes 30,20,7,13,6 (x1..x5) and 2,2,3 (z1..z3)
    maxes = jnp.array(_VOCABS, jnp.int32)
    u = jax.random.uniform(k_data, (B, 8))
    x_att = jnp.floor(u * maxes).astype(jnp.int32)

    pred, outputs, x_enc = s2s_forward(x_att, packed)
    jax.block_until_ready((pred, outputs, x_enc))

    assert pred.shape == (B,)
    assert outputs.shape == (B, 16)
    assert x_enc.shape == (B, EMBED)
    print("KERNEL_OK")
</pallas_src>

<mosaic_0001>
module attributes {stable_mosaic.version = 11 : i64} {
  func.func @s2s_kernel(%arg0: i32, %arg1: memref<8x8xi32, #tpu.memory_space<vmem>>, %arg2: memref<83x64xf32, #tpu.memory_space<vmem>>, %arg3: memref<32x128xf32, #tpu.memory_space<vmem>>, %arg4: memref<96x32xf32, #tpu.memory_space<vmem>>, %arg5: memref<24x128xf32, #tpu.memory_space<vmem>>, %arg6: memref<8x128xf32, #tpu.memory_space<vmem>>) attributes {dimension_semantics = [#tpu.dimension_semantics<parallel>], iteration_bounds = array<i64: 1>, scalar_prefetch = 0 : i64, scratch_operands = 0 : i64, tpu.core_type = #tpu.core_type<tc>, window_params = [{transform_indices = @transform_0, window_bounds = array<i64: 8, 8>}, {pipeline_mode = #tpu.pipeline_mode<synchronous>, transform_indices = @transform_1, window_bounds = array<i64: 83, 64>}, {pipeline_mode = #tpu.pipeline_mode<synchronous>, transform_indices = @transform_2, window_bounds = array<i64: 32, 128>}, {pipeline_mode = #tpu.pipeline_mode<synchronous>, transform_indices = @transform_3, window_bounds = array<i64: 96, 32>}, {pipeline_mode = #tpu.pipeline_mode<synchronous>, transform_indices = @transform_4, window_bounds = array<i64: 24, 128>}, {transform_indices = @transform_5, window_bounds = array<i64: 8, 128>}]} {
    %c0 = arith.constant 0 : index
    %c0_0 = arith.constant 0 : index
    %0 = vector.load %arg1[%c0, %c0_0] : memref<8x8xi32, #tpu.memory_space<vmem>>, vector<8x8xi32>
    %1 = tpu.iota {dimensions = array<i32: 1>} : vector<8x83xi32>
    %cst = arith.constant 0.000000e+00 : f32
    %2 = vector.broadcast %cst : f32 to vector<8x83xf32>
    %3 = vector.extract_strided_slice %0 {offsets = [0, 0], sizes = [8, 1], strides = [1, 1]} : vector<8x8xi32> to vector<8x1xi32>
    %4 = vector.broadcast %3 : vector<8x1xi32> to vector<8x83xi32>
    %5 = arith.cmpi eq, %1, %4 : vector<8x83xi32>
    %6 = arith.extui %5 : vector<8x83xi1> to vector<8x83xi32>
    %7 = arith.sitofp %6 : vector<8x83xi32> to vector<8x83xf32>
    %8 = arith.addf %2, %7 : vector<8x83xf32>
    %9 = vector.extract_strided_slice %0 {offsets = [0, 1], sizes = [8, 1], strides = [1, 1]} : vector<8x8xi32> to vector<8x1xi32>
    %10 = vector.broadcast %9 : vector<8x1xi32> to vector<8x83xi32>
    %11 = arith.cmpi eq, %1, %10 : vector<8x83xi32>
    %12 = arith.extui %11 : vector<8x83xi1> to vector<8x83xi32>
    %13 = arith.sitofp %12 : vector<8x83xi32> to vector<8x83xf32>
    %14 = arith.addf %8, %13 : vector<8x83xf32>
    %15 = vector.extract_strided_slice %0 {offsets = [0, 2], sizes = [8, 1], strides = [1, 1]} : vector<8x8xi32> to vector<8x1xi32>
    %16 = vector.broadcast %15 : vector<8x1xi32> to vector<8x83xi32>
    %17 = arith.cmpi eq, %1, %16 : vector<8x83xi32>
    %18 = arith.extui %17 : vector<8x83xi1> to vector<8x83xi32>
    %19 = arith.sitofp %18 : vector<8x83xi32> to vector<8x83xf32>
    %20 = arith.addf %14, %19 : vector<8x83xf32>
    %21 = vector.extract_strided_slice %0 {offsets = [0, 3], sizes = [8, 1], strides = [1, 1]} : vector<8x8xi32> to vector<8x1xi32>
    %22 = vector.broadcast %21 : vector<8x1xi32> to vector<8x83xi32>
    %23 = arith.cmpi eq, %1, %22 : vector<8x83xi32>
    %24 = arith.extui %23 : vector<8x83xi1> to vector<8x83xi32>
    %25 = arith.sitofp %24 : vector<8x83xi32> to vector<8x83xf32>
    %26 = arith.addf %20, %25 : vector<8x83xf32>
    %27 = vector.extract_strided_slice %0 {offsets = [0, 4], sizes = [8, 1], strides = [1, 1]} : vector<8x8xi32> to vector<8x1xi32>
    %28 = vector.broadcast %27 : vector<8x1xi32> to vector<8x83xi32>
    %29 = arith.cmpi eq, %1, %28 : vector<8x83xi32>
    %30 = arith.extui %29 : vector<8x83xi1> to vector<8x83xi32>
    %31 = arith.sitofp %30 : vector<8x83xi32> to vector<8x83xf32>
    %32 = arith.addf %26, %31 : vector<8x83xf32>
    %33 = vector.extract_strided_slice %0 {offsets = [0, 5], sizes = [8, 1], strides = [1, 1]} : vector<8x8xi32> to vector<8x1xi32>
    %34 = vector.broadcast %33 : vector<8x1xi32> to vector<8x83xi32>
    %35 = arith.cmpi eq, %1, %34 : vector<8x83xi32>
    %36 = arith.extui %35 : vector<8x83xi1> to vector<8x83xi32>
    %37 = arith.sitofp %36 : vector<8x83xi32> to vector<8x83xf32>
    %38 = arith.addf %32, %37 : vector<8x83xf32>
    %39 = vector.extract_strided_slice %0 {offsets = [0, 6], sizes = [8, 1], strides = [1, 1]} : vector<8x8xi32> to vector<8x1xi32>
    %40 = vector.broadcast %39 : vector<8x1xi32> to vector<8x83xi32>
    %41 = arith.cmpi eq, %1, %40 : vector<8x83xi32>
    %42 = arith.extui %41 : vector<8x83xi1> to vector<8x83xi32>
    %43 = arith.sitofp %42 : vector<8x83xi32> to vector<8x83xf32>
    %44 = arith.addf %38, %43 : vector<8x83xf32>
    %45 = vector.extract_strided_slice %0 {offsets = [0, 7], sizes = [8, 1], strides = [1, 1]} : vector<8x8xi32> to vector<8x1xi32>
    %46 = vector.broadcast %45 : vector<8x1xi32> to vector<8x83xi32>
    %47 = arith.cmpi eq, %1, %46 : vector<8x83xi32>
    %48 = arith.extui %47 : vector<8x83xi1> to vector<8x83xi32>
    %49 = arith.sitofp %48 : vector<8x83xi32> to vector<8x83xf32>
    %50 = arith.addf %44, %49 : vector<8x83xf32>
    %c0_1 = arith.constant 0 : index
    %c0_2 = arith.constant 0 : index
    %51 = vector.load %arg2[%c0_1, %c0_2] : memref<83x64xf32, #tpu.memory_space<vmem>>, vector<83x64xf32>
    %cst_3 = arith.constant dense<0.000000e+00> : vector<8x64xf32>
    %52 = tpu.matmul %50, %51, %cst_3 {dimension_numbers = #tpu.dot_dimension_numbers<[1], [0], [0], [1], [0, 0, 1, 1], [], []>, precision = #tpu.contract_precision<fp32>} : vector<8x83xf32>, vector<83x64xf32>, vector<8x64xf32> -> vector<8x64xf32>
    %53 = vector.extract_strided_slice %52 {offsets = [0, 0], sizes = [8, 32], strides = [1, 1]} : vector<8x64xf32> to vector<8x32xf32>
    %54 = vector.extract_strided_slice %52 {offsets = [0, 32], sizes = [8, 32], strides = [1, 1]} : vector<8x64xf32> to vector<8x32xf32>
    %c0_4 = arith.constant 0 : index
    %c0_5 = arith.constant 0 : index
    %55 = vector.load %arg3[%c0_4, %c0_5] : memref<32x128xf32, #tpu.memory_space<vmem>>, vector<32x128xf32>
    %56 = vector.extract_strided_slice %55 {offsets = [0, 0], sizes = [32, 32], strides = [1, 1]} : vector<32x128xf32> to vector<32x32xf32>
    %57 = vector.extract_strided_slice %55 {offsets = [0, 32], sizes = [32, 32], strides = [1, 1]} : vector<32x128xf32> to vector<32x32xf32>
    %58 = vector.extract_strided_slice %55 {offsets = [0, 64], sizes = [32, 64], strides = [1, 1]} : vector<32x128xf32> to vector<32x64xf32>
    %cst_6 = arith.constant dense<0.000000e+00> : vector<8x32xf32>
    %59 = tpu.matmul %53, %56, %cst_6 {dimension_numbers = #tpu.dot_dimension_numbers<[1], [0], [0], [1], [0, 0, 1, 1], [], []>} : vector<8x32xf32>, vector<32x32xf32>, vector<8x32xf32> -> vector<8x32xf32>
    %c0_7 = arith.constant 0 : index
    %c0_8 = arith.constant 0 : index
    %60 = vector.load %arg5[%c0_7, %c0_8] : memref<24x128xf32, #tpu.memory_space<vmem>>, vector<1x32xf32>
    %61 = vector.broadcast %60 : vector<1x32xf32> to vector<8x32xf32>
    %62 = arith.addf %59, %61 : vector<8x32xf32>
    %c1 = arith.constant 1 : index
    %c0_9 = arith.constant 0 : index
    %63 = vector.load %arg5[%c1, %c0_9] : memref<24x128xf32, #tpu.memory_space<vmem>>, vector<1x32xf32>
    %c2 = arith.constant 2 : index
    %c0_10 = arith.constant 0 : index
    %64 = vector.load %arg5[%c2, %c0_10] : memref<24x128xf32, #tpu.memory_space<vmem>>, vector<1x32xf32>
    %cst_11 = arith.constant dense<0.000000e+00> : vector<8xf32>
    %65 = vector.multi_reduction <add>, %62, %cst_11 [1] : vector<8x32xf32> to vector<8xf32>
    %66 = vector.shape_cast %65 : vector<8xf32> to vector<8x1xf32>
    %cst_12 = arith.constant 3.200000e+01 : f32
    %67 = vector.broadcast %cst_12 : f32 to vector<8x1xf32>
    %68 = arith.divf %66, %67 : vector<8x1xf32>
    %69 = vector.broadcast %68 : vector<8x1xf32> to vector<8x32xf32>
    %70 = arith.subf %62, %69 : vector<8x32xf32>
    %71 = arith.mulf %70, %70 : vector<8x32xf32>
    %cst_13 = arith.constant dense<0.000000e+00> : vector<8xf32>
    %72 = vector.multi_reduction <add>, %71, %cst_13 [1] : vector<8x32xf32> to vector<8xf32>
    %73 = vector.shape_cast %72 : vector<8xf32> to vector<8x1xf32>
    %cst_14 = arith.constant 3.200000e+01 : f32
    %74 = vector.broadcast %cst_14 : f32 to vector<8x1xf32>
    %75 = arith.divf %73, %74 : vector<8x1xf32>
    %76 = vector.broadcast %68 : vector<8x1xf32> to vector<8x32xf32>
    %77 = arith.subf %62, %76 : vector<8x32xf32>
    %cst_15 = arith.constant 9.99999974E-6 : f32
    %78 = vector.broadcast %cst_15 : f32 to vector<8x1xf32>
    %79 = arith.addf %75, %78 : vector<8x1xf32>
    %80 = math.rsqrt %79 : vector<8x1xf32>
    %81 = vector.broadcast %80 : vector<8x1xf32> to vector<8x32xf32>
    %82 = arith.mulf %77, %81 : vector<8x32xf32>
    %83 = vector.broadcast %63 : vector<1x32xf32> to vector<8x32xf32>
    %84 = arith.mulf %82, %83 : vector<8x32xf32>
    %85 = vector.broadcast %64 : vector<1x32xf32> to vector<8x32xf32>
    %86 = arith.addf %84, %85 : vector<8x32xf32>
    %cst_16 = arith.constant 0.000000e+00 : f32
    %87 = vector.broadcast %cst_16 : f32 to vector<8x32xf32>
    %88 = arith.maximumf %86, %87 : vector<8x32xf32>
    %cst_17 = arith.constant dense<0.000000e+00> : vector<8x32xf32>
    %89 = tpu.matmul %88, %57, %cst_17 {dimension_numbers = #tpu.dot_dimension_numbers<[1], [0], [0], [1], [0, 0, 1, 1], [], []>} : vector<8x32xf32>, vector<32x32xf32>, vector<8x32xf32> -> vector<8x32xf32>
    %c3 = arith.constant 3 : index
    %c0_18 = arith.constant 0 : index
    %90 = vector.load %arg5[%c3, %c0_18] : memref<24x128xf32, #tpu.memory_space<vmem>>, vector<1x32xf32>
    %91 = vector.broadcast %90 : vector<1x32xf32> to vector<8x32xf32>
    %92 = arith.addf %89, %91 : vector<8x32xf32>
    %c4 = arith.constant 4 : index
    %c0_19 = arith.constant 0 : index
    %93 = vector.load %arg5[%c4, %c0_19] : memref<24x128xf32, #tpu.memory_space<vmem>>, vector<1x32xf32>
    %c5 = arith.constant 5 : index
    %c0_20 = arith.constant 0 : index
    %94 = vector.load %arg5[%c5, %c0_20] : memref<24x128xf32, #tpu.memory_space<vmem>>, vector<1x32xf32>
    %cst_21 = arith.constant dense<0.000000e+00> : vector<8xf32>
    %95 = vector.multi_reduction <add>, %92, %cst_21 [1] : vector<8x32xf32> to vector<8xf32>
    %96 = vector.shape_cast %95 : vector<8xf32> to vector<8x1xf32>
    %cst_22 = arith.constant 3.200000e+01 : f32
    %97 = vector.broadcast %cst_22 : f32 to vector<8x1xf32>
    %98 = arith.divf %96, %97 : vector<8x1xf32>
    %99 = vector.broadcast %98 : vector<8x1xf32> to vector<8x32xf32>
    %100 = arith.subf %92, %99 : vector<8x32xf32>
    %101 = arith.mulf %100, %100 : vector<8x32xf32>
    %cst_23 = arith.constant dense<0.000000e+00> : vector<8xf32>
    %102 = vector.multi_reduction <add>, %101, %cst_23 [1] : vector<8x32xf32> to vector<8xf32>
    %103 = vector.shape_cast %102 : vector<8xf32> to vector<8x1xf32>
    %cst_24 = arith.constant 3.200000e+01 : f32
    %104 = vector.broadcast %cst_24 : f32 to vector<8x1xf32>
    %105 = arith.divf %103, %104 : vector<8x1xf32>
    %106 = vector.broadcast %98 : vector<8x1xf32> to vector<8x32xf32>
    %107 = arith.subf %92, %106 : vector<8x32xf32>
    %cst_25 = arith.constant 9.99999974E-6 : f32
    %108 = vector.broadcast %cst_25 : f32 to vector<8x1xf32>
    %109 = arith.addf %105, %108 : vector<8x1xf32>
    %110 = math.rsqrt %109 : vector<8x1xf32>
    %111 = vector.broadcast %110 : vector<8x1xf32> to vector<8x32xf32>
    %112 = arith.mulf %107, %111 : vector<8x32xf32>
    %113 = vector.broadcast %93 : vector<1x32xf32> to vector<8x32xf32>
    %114 = arith.mulf %112, %113 : vector<8x32xf32>
    %115 = vector.broadcast %94 : vector<1x32xf32> to vector<8x32xf32>
    %116 = arith.addf %114, %115 : vector<8x32xf32>
    %117 = arith.addf %116, %53 : vector<8x32xf32>
    %cst_26 = arith.constant 0.000000e+00 : f32
    %118 = vector.broadcast %cst_26 : f32 to vector<8x32xf32>
    %119 = arith.maximumf %117, %118 : vector<8x32xf32>
    %120 = arith.addf %119, %54 : vector<8x32xf32>
    %cst_27 = arith.constant dense<0.000000e+00> : vector<8x64xf32>
    %121 = tpu.matmul %120, %58, %cst_27 {dimension_numbers = #tpu.dot_dimension_numbers<[1], [0], [0], [1], [0, 0, 1, 1], [], []>} : vector<8x32xf32>, vector<32x64xf32>, vector<8x64xf32> -> vector<8x64xf32>
    %c6 = arith.constant 6 : index
    %c0_28 = arith.constant 0 : index
    %122 = vector.load %arg5[%c6, %c0_28] : memref<24x128xf32, #tpu.memory_space<vmem>>, vector<1x64xf32>
    %123 = vector.broadcast %122 : vector<1x64xf32> to vector<8x64xf32>
    %124 = arith.addf %121, %123 : vector<8x64xf32>
    %c7 = arith.constant 7 : index
    %c0_29 = arith.constant 0 : index
    %125 = vector.load %arg5[%c7, %c0_29] : memref<24x128xf32, #tpu.memory_space<vmem>>, vector<1x64xf32>
    %c8 = arith.constant 8 : index
    %c0_30 = arith.constant 0 : index
    %126 = vector.load %arg5[%c8, %c0_30] : memref<24x128xf32, #tpu.memory_space<vmem>>, vector<1x64xf32>
    %cst_31 = arith.constant dense<0.000000e+00> : vector<8xf32>
    %127 = vector.multi_reduction <add>, %124, %cst_31 [1] : vector<8x64xf32> to vector<8xf32>
    %128 = vector.shape_cast %127 : vector<8xf32> to vector<8x1xf32>
    %cst_32 = arith.constant 6.400000e+01 : f32
    %129 = vector.broadcast %cst_32 : f32 to vector<8x1xf32>
    %130 = arith.divf %128, %129 : vector<8x1xf32>
    %131 = vector.broadcast %130 : vector<8x1xf32> to vector<8x64xf32>
    %132 = arith.subf %124, %131 : vector<8x64xf32>
    %133 = arith.mulf %132, %132 : vector<8x64xf32>
    %cst_33 = arith.constant dense<0.000000e+00> : vector<8xf32>
    %134 = vector.multi_reduction <add>, %133, %cst_33 [1] : vector<8x64xf32> to vector<8xf32>
    %135 = vector.shape_cast %134 : vector<8xf32> to vector<8x1xf32>
    %cst_34 = arith.constant 6.400000e+01 : f32
    %136 = vector.broadcast %cst_34 : f32 to vector<8x1xf32>
    %137 = arith.divf %135, %136 : vector<8x1xf32>
    %138 = vector.broadcast %130 : vector<8x1xf32> to vector<8x64xf32>
    %139 = arith.subf %124, %138 : vector<8x64xf32>
    %cst_35 = arith.constant 9.99999974E-6 : f32
    %140 = vector.broadcast %cst_35 : f32 to vector<8x1xf32>
    %141 = arith.addf %137, %140 : vector<8x1xf32>
    %142 = math.rsqrt %141 : vector<8x1xf32>
    %143 = vector.broadcast %142 : vector<8x1xf32> to vector<8x64xf32>
    %144 = arith.mulf %139, %143 : vector<8x64xf32>
    %145 = vector.broadcast %125 : vector<1x64xf32> to vector<8x64xf32>
    %146 = arith.mulf %144, %145 : vector<8x64xf32>
    %147 = vector.broadcast %126 : vector<1x64xf32> to vector<8x64xf32>
    %148 = arith.addf %146, %147 : vector<8x64xf32>
    %cst_36 = arith.constant 0.000000e+00 : f32
    %149 = vector.broadcast %cst_36 : f32 to vector<8x64xf32>
    %150 = arith.maximumf %148, %149 : vector<8x64xf32>
    %151 = tpu.concatenate %150, %120 in 1 : vector<8x64xf32>, vector<8x32xf32> -> vector<8x96xf32>
    %c0_37 = arith.constant 0 : index
    %c0_38 = arith.constant 0 : index
    %152 = vector.load %arg4[%c0_37, %c0_38] : memref<96x32xf32, #tpu.memory_space<vmem>>, vector<96x32xf32>
    %cst_39 = arith.constant dense<0.000000e+00> : vector<8x32xf32>
    %153 = tpu.matmul %151, %152, %cst_39 {dimension_numbers = #tpu.dot_dimension_numbers<[1], [0], [0], [1], [0, 0, 1, 1], [], []>} : vector<8x96xf32>, vector<96x32xf32>, vector<8x32xf32> -> vector<8x32xf32>
    %154 = vector.extract_strided_slice %153 {offsets = [0, 0], sizes = [8, 16], strides = [1, 1]} : vector<8x32xf32> to vector<8x16xf32>
    %c9 = arith.constant 9 : index
    %c0_40 = arith.constant 0 : index
    %155 = vector.load %arg5[%c9, %c0_40] : memref<24x128xf32, #tpu.memory_space<vmem>>, vector<1x16xf32>
    %156 = vector.broadcast %155 : vector<1x16xf32> to vector<8x16xf32>
    %157 = arith.addf %154, %156 : vector<8x16xf32>
    %c10 = arith.constant 10 : index
    %c0_41 = arith.constant 0 : index
    %158 = vector.load %arg5[%c10, %c0_41] : memref<24x128xf32, #tpu.memory_space<vmem>>, vector<1x16xf32>
    %c11 = arith.constant 11 : index
    %c0_42 = arith.constant 0 : index
    %159 = vector.load %arg5[%c11, %c0_42] : memref<24x128xf32, #tpu.memory_space<vmem>>, vector<1x16xf32>
    %cst_43 = arith.constant dense<0.000000e+00> : vector<8xf32>
    %160 = vector.multi_reduction <add>, %157, %cst_43 [1] : vector<8x16xf32> to vector<8xf32>
    %161 = vector.shape_cast %160 : vector<8xf32> to vector<8x1xf32>
    %cst_44 = arith.constant 1.600000e+01 : f32
    %162 = vector.broadcast %cst_44 : f32 to vector<8x1xf32>
    %163 = arith.divf %161, %162 : vector<8x1xf32>
    %164 = vector.broadcast %163 : vector<8x1xf32> to vector<8x16xf32>
    %165 = arith.subf %157, %164 : vector<8x16xf32>
    %166 = arith.mulf %165, %165 : vector<8x16xf32>
    %cst_45 = arith.constant dense<0.000000e+00> : vector<8xf32>
    %167 = vector.multi_reduction <add>, %166, %cst_45 [1] : vector<8x16xf32> to vector<8xf32>
    %168 = vector.shape_cast %167 : vector<8xf32> to vector<8x1xf32>
    %cst_46 = arith.constant 1.600000e+01 : f32
    %169 = vector.broadcast %cst_46 : f32 to vector<8x1xf32>
    %170 = arith.divf %168, %169 : vector<8x1xf32>
    %171 = vector.broadcast %163 : vector<8x1xf32> to vector<8x16xf32>
    %172 = arith.subf %157, %171 : vector<8x16xf32>
    %cst_47 = arith.constant 9.99999974E-6 : f32
    %173 = vector.broadcast %cst_47 : f32 to vector<8x1xf32>
    %174 = arith.addf %170, %173 : vector<8x1xf32>
    %175 = math.rsqrt %174 : vector<8x1xf32>
    %176 = vector.broadcast %175 : vector<8x1xf32> to vector<8x16xf32>
    %177 = arith.mulf %172, %176 : vector<8x16xf32>
    %178 = vector.broadcast %158 : vector<1x16xf32> to vector<8x16xf32>
    %179 = arith.mulf %177, %178 : vector<8x16xf32>
    %180 = vector.broadcast %159 : vector<1x16xf32> to vector<8x16xf32>
    %181 = arith.addf %179, %180 : vector<8x16xf32>
    %182 = vector.extract_strided_slice %153 {offsets = [0, 16], sizes = [8, 16], strides = [1, 1]} : vector<8x32xf32> to vector<8x16xf32>
    %c12 = arith.constant 12 : index
    %c0_48 = arith.constant 0 : index
    %183 = vector.load %arg5[%c12, %c0_48] : memref<24x128xf32, #tpu.memory_space<vmem>>, vector<1x16xf32>
    %184 = vector.broadcast %183 : vector<1x16xf32> to vector<8x16xf32>
    %185 = arith.addf %182, %184 : vector<8x16xf32>
    %c13 = arith.constant 13 : index
    %c0_49 = arith.constant 0 : index
    %186 = vector.load %arg5[%c13, %c0_49] : memref<24x128xf32, #tpu.memory_space<vmem>>, vector<1x16xf32>
    %c14 = arith.constant 14 : index
    %c0_50 = arith.constant 0 : index
    %187 = vector.load %arg5[%c14, %c0_50] : memref<24x128xf32, #tpu.memory_space<vmem>>, vector<1x16xf32>
    %cst_51 = arith.constant dense<0.000000e+00> : vector<8xf32>
    %188 = vector.multi_reduction <add>, %185, %cst_51 [1] : vector<8x16xf32> to vector<8xf32>
    %189 = vector.shape_cast %188 : vector<8xf32> to vector<8x1xf32>
    %cst_52 = arith.constant 1.600000e+01 : f32
    %190 = vector.broadcast %cst_52 : f32 to vector<8x1xf32>
    %191 = arith.divf %189, %190 : vector<8x1xf32>
    %192 = vector.broadcast %191 : vector<8x1xf32> to vector<8x16xf32>
    %193 = arith.subf %185, %192 : vector<8x16xf32>
    %194 = arith.mulf %193, %193 : vector<8x16xf32>
    %cst_53 = arith.constant dense<0.000000e+00> : vector<8xf32>
    %195 = vector.multi_reduction <add>, %194, %cst_53 [1] : vector<8x16xf32> to vector<8xf32>
    %196 = vector.shape_cast %195 : vector<8xf32> to vector<8x1xf32>
    %cst_54 = arith.constant 1.600000e+01 : f32
    %197 = vector.broadcast %cst_54 : f32 to vector<8x1xf32>
    %198 = arith.divf %196, %197 : vector<8x1xf32>
    %199 = vector.broadcast %191 : vector<8x1xf32> to vector<8x16xf32>
    %200 = arith.subf %185, %199 : vector<8x16xf32>
    %cst_55 = arith.constant 9.99999974E-6 : f32
    %201 = vector.broadcast %cst_55 : f32 to vector<8x1xf32>
    %202 = arith.addf %198, %201 : vector<8x1xf32>
    %203 = math.rsqrt %202 : vector<8x1xf32>
    %204 = vector.broadcast %203 : vector<8x1xf32> to vector<8x16xf32>
    %205 = arith.mulf %200, %204 : vector<8x16xf32>
    %206 = vector.broadcast %186 : vector<1x16xf32> to vector<8x16xf32>
    %207 = arith.mulf %205, %206 : vector<8x16xf32>
    %208 = vector.broadcast %187 : vector<1x16xf32> to vector<8x16xf32>
    %209 = arith.addf %207, %208 : vector<8x16xf32>
    %210 = arith.addf %181, %209 : vector<8x16xf32>
    %cst_56 = arith.constant 0.000000e+00 : f32
    %211 = vector.broadcast %cst_56 : f32 to vector<8x16xf32>
    %212 = arith.maximumf %210, %211 : vector<8x16xf32>
    %c15 = arith.constant 15 : index
    %c0_57 = arith.constant 0 : index
    %213 = vector.load %arg5[%c15, %c0_57] : memref<24x128xf32, #tpu.memory_space<vmem>>, vector<1x16xf32>
    %c16 = arith.constant 16 : index
    %c0_58 = arith.constant 0 : index
    %214 = vector.load %arg5[%c16, %c0_58] : memref<24x128xf32, #tpu.memory_space<vmem>>, vector<1x1xf32>
    %215 = vector.broadcast %213 : vector<1x16xf32> to vector<8x16xf32>
    %216 = arith.mulf %212, %215 : vector<8x16xf32>
    %cst_59 = arith.constant dense<0.000000e+00> : vector<8xf32>
    %217 = vector.multi_reduction <add>, %216, %cst_59 [1] : vector<8x16xf32> to vector<8xf32>
    %218 = vector.shape_cast %217 : vector<8xf32> to vector<8x1xf32>
    %219 = vector.broadcast %214 : vector<1x1xf32> to vector<8x1xf32>
    %220 = arith.addf %218, %219 : vector<8x1xf32>
    %cst_60 = arith.constant 0.000000e+00 : f32
    %221 = vector.broadcast %cst_60 : f32 to vector<8x79xf32>
    %222 = tpu.concatenate %119, %212, %220, %221 in 1 : vector<8x32xf32>, vector<8x16xf32>, vector<8x1xf32>, vector<8x79xf32> -> vector<8x128xf32>
    %c0_61 = arith.constant 0 : index
    %c0_62 = arith.constant 0 : index
    %223 = vector.load %arg6[%c0_61, %c0_62] : memref<8x128xf32, #tpu.memory_space<vmem>>, vector<8x128xf32>
    tpu.vector_store %arg6[%c0_61, %c0_62], %222 {strides = array<i32>} : memref<8x128xf32, #tpu.memory_space<vmem>>, vector<8x128xf32>,
    return
  }
  func.func @transform_0(%arg0: i32) -> (i32, i32) {
    %c0_i32 = arith.constant 0 : i32
    %c0_i32_0 = arith.constant 0 : i32
    return %arg0, %c0_i32 : i32, i32
  }
  func.func @transform_1(%arg0: i32) -> (i32, i32) {
    %c0_i32 = arith.constant 0 : i32
    %c0_i32_0 = arith.constant 0 : i32
    %c0_i32_1 = arith.constant 0 : i32
    return %c0_i32, %c0_i32_0 : i32, i32
  }
  func.func @transform_2(%arg0: i32) -> (i32, i32) {
    %c0_i32 = arith.constant 0 : i32
    %c0_i32_0 = arith.constant 0 : i32
    %c0_i32_1 = arith.constant 0 : i32
    return %c0_i32, %c0_i32_0 : i32, i32
  }
  func.func @transform_3(%arg0: i32) -> (i32, i32) {
    %c0_i32 = arith.constant 0 : i32
    %c0_i32_0 = arith.constant 0 : i32
    %c0_i32_1 = arith.constant 0 : i32
    return %c0_i32, %c0_i32_0 : i32, i32
  }
  func.func @transform_4(%arg0: i32) -> (i32, i32) {
    %c0_i32 = arith.constant 0 : i32
    %c0_i32_0 = arith.constant 0 : i32
    %c0_i32_1 = arith.constant 0 : i32
    return %c0_i32, %c0_i32_0 : i32, i32
  }
  func.func @transform_5(%arg0: i32) -> (i32, i32) {
    %c0_i32 = arith.constant 0 : i32
    %c0_i32_0 = arith.constant 0 : i32
    return %arg0, %c0_i32 : i32, i32
  }
}

</mosaic_0001>

<bundles_post_ra>
// kernel: s2s_forward.1
= control target key start
LH: loop header
LB: loop body
LE: loop exit
PB: predicated region body
PF: predicated region fallthrough
CT: control target
= control target key end

     0   :  { %v844_v0 = vmov 0   ;;  %v845_v1 = vmov 2   ;;  %vm94_vm0 = vcmask 1042432   ;;  %v846_v7 = vmov 4   ;;  %s855_s30 = smov 64   ;;  %s857_s10 = smov 16   ;;  %s1179_s0 = inlined_call_operand.vmem [shape: s32[8,8], index: 0, kind: input, shape index: {}]   ;;  %s1180_s1 = inlined_call_operand.vmem [shape: f32[83,64], index: 1, kind: input, shape index: {}]   ;;  %s1181_s4 = inlined_call_operand.vmem [shape: f32[24,128], index: 4, kind: input, shape index: {}]   ;;  %s1182_s2 = inlined_call_operand.vmem [shape: f32[32,128], index: 2, kind: input, shape index: {}]   ;;  %s1183_s3 = inlined_call_operand.vmem [shape: f32[96,32], index: 3, kind: input, shape index: {}]   ;;  %s1184_s5 = inlined_call_operand.vmem [shape: f32[8,128], index: 5, kind: output, shape index: {}]  }
   0x1   :  { %782 = vset.pattern.permute.xlu0 %v844_v0  ;;  %784 = vset.pattern.permute.xlu1 %v845_v1  ;;  %v20_v2 = vld [vmem:[%s1179_s0] sm:$0xff]  ;;  %v88_v3 = vld [vmem:[%s1180_s1 + $0x48] sm:$0xff]  ;;  %v89_v4 = vld [vmem:[%s1180_s1 + $0x50] sm:$0x7]  ;;  %v847_v18 = vmov 1   ;;  %v848_v19 = vmov 3  }
   0x2   :  { %24 = vperm.xlu0 %782, %v20_v2   ;;  %38 = vperm.xlu1 %784, %v20_v2   ;;  %v901_v5 = vand.u32 4294901760, %v88_v3  ;;  %v87_v6 = vld [vmem:[%s1180_s1 + $0x40] sm:$0xff]  ;;  %v96_v8 = vsel %vm94_vm0, %v89_v4, 0  ;;  %v849_v22 = vmov 5   ;;  %v850_v26 = vmov 6   ;;  %v86_v28 = vld [vmem:[%s1180_s1 + $0x38] sm:$0xff] }
   0x3   :  { %786 = vset.pattern.permute.xlu2 %v846_v7  ;;  %v906_v9 = vand.u32 4294901760, %v87_v6  ;;  %v908_v10 = vand.u32 4294901760, %v96_v8  ;;  %v851_v27 = vmov 7   ;;  %v943_v29 = vand.u32 4294901760, %v86_v28  ;;  %v85_v30 = vld [vmem:[%s1180_s1 + $0x30] sm:$0xff]  ;;  %v84_v33 = vld [vmem:[%s1180_s1 + $0x28] sm:$0xff] }
   0x4   :  { %52 = vperm.xlu2 %786, %v20_v2   ;;  %v911_v11 = vsub.f32 %v88_v3, %v901_v5  ;;  %v951_v32 = vand.u32 4294901760, %v85_v30  ;;  %v962_v36 = vand.u32 4294901760, %v84_v33  ;;  %v83_v37 = vld [vmem:[%s1180_s1 + $0x20] sm:$0xff]  ;;  %v82_v42 = vld [vmem:[%s1180_s1 + $0x18] sm:$0xff]  ;;  %v81_v48 = vld [vmem:[%s1180_s1 + $0x10] sm:$0xff]  ;;  %vm90_vm9 = vcmask 678912  }
   0x5   :  { %v914_v12 = vsub.f32 %v87_v6, %v906_v9  ;;  %v917_v13 = vsub.f32 %v96_v8, %v908_v10  ;;  %104 = vmatpush.msra.mxu0 %v908_v10  ;;  %260 = vmatpush.msra.mxu3 %v908_v10  ;;  %v949_v31 = vsub.f32 %v86_v28, %v943_v29  ;;  %v977_v41 = vand.u32 4294901760, %v83_v37  ;;  %v80_v54 = vld [vmem:[%s1180_s1 + $0x8] sm:$0xff]  ;;  %v79_v60 = vld [vmem:[%s1180_s1] sm:$0xff]  ;;  %s858_s1 = smov 112   ;;  %s860_s25 = smov 32  }
   0x6   :  { %v147_v14 = vand.u32 4294901760, %v911_v11  ;;  %v960_v35 = vsub.f32 %v85_v30, %v951_v32  ;;  %v975_v40 = vsub.f32 %v84_v33, %v962_v36  ;;  %v994_v47 = vand.u32 4294901760, %v82_v42  ;;  %s861_s27 = smov 48  }
   0x7   :  { %v153_v15 = vand.u32 4294901760, %v914_v12  ;;  %v141_v16 = vand.u32 4294901760, %v917_v13  ;;  %106 = vmatpush.msra.mxu0 %v901_v5  ;;  %217 = vmatpush.msra.mxu2 %v917_v13  ;;  %v159_v34 = vand.u32 4294901760, %v949_v31  ;;  %v990_v46 = vsub.f32 %v83_v37, %v977_v41 }
   0x8   :  { %v148_v17 = vsub.f32 %v911_v11, %v147_v14  ;;  %262 = vmatpush.msra.mxu3 %v901_v5  ;;  %v165_v39 = vand.u32 4294901760, %v960_v35  ;;  %v171_v45 = vand.u32 4294901760, %v975_v40  ;;  %v1002_v52 = vand.u32 4294901760, %v81_v48 }
   0x9   :  { %v142_v20 = vsub.f32 %v917_v13, %v141_v16  ;;  %v154_v21 = vsub.f32 %v914_v12, %v153_v15  ;;  %108 = vmatpush.msra.mxu0 %v906_v9  ;;  %220 = vmatpush.msra.mxu2 %v911_v11  ;;  %v160_v38 = vsub.f32 %v949_v31, %v159_v34  ;;  %v177_v51 = vand.u32 4294901760, %v990_v46 }
   0xa   :  { %783 = vset.pattern.permute.xlu0 %v847_v18  ;;  %785 = vset.pattern.permute.xlu1 %v848_v19  ;;  %v149_v24 = vand.u32 4294901760, %v148_v17  ;;  %v166_v44 = vsub.f32 %v960_v35, %v165_v39  ;;  %v172_v50 = vsub.f32 %v975_v40, %v171_v45  ;;  %v182_v53 = vsub.f32 %v82_v42, %v994_v47 }
   0xb   :  { %31 = vperm.xlu0 %783, %v20_v2   ;;  %45 = vperm.xlu1 %785, %v20_v2   ;;  %v143_v23 = vand.u32 4294901760, %v142_v20  ;;  %v155_v25 = vand.u32 4294901760, %v154_v21  ;;  %v161_v43 = vand.u32 4294901760, %v160_v38  ;;  %v178_v56 = vsub.f32 %v990_v46, %v177_v51 }
   0xc   :  { %787 = vset.pattern.permute.xlu2 %v849_v22  ;;  %264 = vmatpush.msra.mxu3 %v906_v9  ;;  %v167_v49 = vand.u32 4294901760, %v166_v44  ;;  %v173_v55 = vand.u32 4294901760, %v172_v50  ;;  %v188_v57 = vsub.f32 %v81_v48, %v1002_v52  ;;  %v121_v58 = vand.u32 4294901760, %v80_v54  ;;  %v377_v44 = vld [vmem:[%s1182_s2 + $0x18] sm:$0xff] }
   0xd   :  { %59 = vperm.xlu2 %787, %v20_v2   ;;  %144 = vmatpush.msra.mxu1 %v143_v23  ;;  %v183_v59 = vand.u32 4294901760, %v182_v53  ;;  %v179_v61 = vand.u32 4294901760, %v178_v56  ;;  %v123_v0 = vand.u32 4294901760, %v79_v60  ;;  %vm380_vm10 = vcmask 261120  }
   0xe   :  { %223 = vmatpush.msra.mxu2 %v914_v12  ;;  %110 = vmatpush.msra.mxu0 %v943_v29  ;;  %v189_v62 = vand.u32 4294901760, %v188_v57  ;;  %v194_v63 = vsub.f32 %v80_v54, %v121_v58 }
   0xf   :  { %150 = vmatpush.msra.mxu1 %v149_v24  ;;  %266 = vmatpush.msra.mxu3 %v943_v29  ;;  %v184_v1 = vsub.f32 %v182_v53, %v183_v59  ;;  %v200_v4 = vsub.f32 %v79_v60, %v123_v0 }
  0x10   :  { %112 = vmatpush.msra.mxu0 %v951_v32  ;;  %226 = vmatpush.msra.mxu2 %v949_v31  ;;  %v195_v3 = vand.u32 4294901760, %v194_v63 }
  0x11   :  { %156 = vmatpush.msra.mxu1 %v155_v25  ;;  %268 = vmatpush.msra.mxu3 %v951_v32  ;;  %v185_v6 = vand.u32 4294901760, %v184_v1  ;;  %v201_v17 = vand.u32 4294901760, %v200_v4 }
  0x12   :  { %114 = vmatpush.msra.mxu0 %v962_v36  ;;  %229 = vmatpush.msra.mxu2 %v960_v35  ;;  %v196_v8 = vsub.f32 %v194_v63, %v195_v3 }
  0x13   :  { %788 = vset.pattern.permute.xlu1 %v850_v26  ;;  %810 = vset.pattern.permute.xlu0 %v851_v27  ;;  %v202_v19 = vsub.f32 %v200_v4, %v201_v17 }
  0x14   :  { %66 = vperm.xlu1 %788, %v20_v2   ;;  %270 = vmatpush.msra.mxu3 %v962_v36  ;;  %v197_v18 = vand.u32 4294901760, %v196_v8 }
  0x15   :  { %789 = vset.pattern.permute.xlu2 %v851_v27  ;;  %116 = vmatpush.msra.mxu0 %v977_v41  ;;  %v203_v20 = vand.u32 4294901760, %v202_v19 }
  0x16   :  { %73 = vperm.xlu2 %789, %v20_v2   ;;  %232 = vmatpush.msra.mxu2 %v975_v40  ;;  %v190_v2 = vsub.f32 %v188_v57, %v189_v62 }
  0x17   :  { %272 = vmatpush.msra.mxu3 %v977_v41  ;;  %162 = vmatpush.msra.mxu1 %v161_v43 }
  0x18   :  { %235 = vmatpush.msra.mxu2 %v990_v46  ;;  %118 = vmatpush.msra.mxu0 %v994_v47  ;;  %v191_v7 = vand.u32 4294901760, %v190_v2  ;;  %v375_v46 = vld [vmem:[%s1182_s2 + $0x8] sm:$0xff] }
  0x19   :  { %274 = vmatpush.msra.mxu3 %v994_v47  ;;  %168 = vmatpush.msra.mxu1 %v167_v49 }
  0x1a   :  { %120 = vmatpush.msra.mxu0 %v1002_v52  ;;  %238 = vmatpush.msra.mxu2 %v182_v53 }
  0x1b   :  { %174 = vmatpush.msra.mxu1 %v173_v55  ;;  %276 = vmatpush.msra.mxu3 %v1002_v52 }
  0x1c   :  { %122 = vmatpush.msra.mxu0 %v121_v58  ;;  %241 = vmatpush.msra.mxu2 %v188_v57 }
  0x1d   :  { %180 = vmatpush.msra.mxu1 %v179_v61  ;;  %278 = vmatpush.msra.mxu3 %v121_v58 }
  0x1e   :  { %124 = vmatpush.msra.mxu0 %v123_v0  ;;  %244 = vmatpush.msra.mxu2 %v194_v63  ;;  %v853_v63 = vmov 32.0  }
  0x1f   :  { %280 = vmatpush.msra.mxu3 %v123_v0  ;;  %186 = vmatpush.msra.mxu1 %v185_v6  ;;  %828 = vrcp.f32 %v853_v63  ;;  %v816_v63 = vld [vmem:[%s1181_s4 + $0x5] ss:$0 sm:$0xff] }
  0x20   :  { %296 = vmatpush.msrb.mxu0 %v141_v16  ;;  %247 = vmatpush.msra.mxu2 %v200_v4  ;;  %v852_v16 = vmov 0.0  }
  0x21   :  { %192 = vmatpush.msra.mxu1 %v191_v7 }
  0x22   :  { %300 = vmatpush.msrb.mxu0 %v147_v14  ;;  %396 = vmatpush.msrb.mxu2 %v377_v44 }
  0x23   :  { %198 = vmatpush.msra.mxu1 %v197_v18 }
  0x24   :  { %304 = vmatpush.msrb.mxu0 %v153_v15 }
  0x25   :  { %204 = vmatpush.msra.mxu1 %v203_v20  ;;  %v829_v1 = vpop.eup %828 }
  0x26   :  { %308 = vmatpush.msrb.mxu0 %v159_v34  ;;  %v410_v2 = vmul.f32 32.0, %v829_v1  ;;  %vm414_vm11 = vweird.f32 %v829_v1 }
  0x27   :  { %348 = vmatpush.msrb.mxu1 %v908_v10 }
  0x28   :  { %312 = vmatpush.msrb.mxu0 %v165_v39  ;;  %v411_v4 = vsub.f32 1.0, %v410_v2 }
  0x29   :  { %350 = vmatpush.msrb.mxu1 %v901_v5  ;;  %v21_v5 = vlaneseq }
  0x2a   :  { %316 = vmatpush.msrb.mxu0 %v171_v45  ;;  %v376_v45 = vld [vmem:[%s1182_s2 + $0x10] sm:$0xff]  ;;  %v412_v6 = vmul.f32 %v829_v1, %v411_v4 }
  0x2b   :  { %352 = vmatpush.msrb.mxu1 %v906_v9  ;;  %v22_v9 = vand.u32 127, %v21_v5  ;;  %397 = vmatpush.msrb.mxu2 %v376_v45 }
  0x2c   :  { %320 = vmatpush.msrb.mxu0 %v177_v51  ;;  %v413_v7 = vadd.f32 %v829_v1, %v412_v6 }
  0x2d   :  { %354 = vmatpush.msrb.mxu1 %v943_v29  ;;  %398 = vmatpush.msrb.mxu2 %v375_v46 }
  0x2e   :  { %324 = vmatpush.msrb.mxu0 %v183_v59  ;;  %v811_v59 = vld [vmem:[%s1181_s4] ss:$0 sm:$0xff]  ;;  %v415_v8 = vsel %vm414_vm11, %v829_v1, %v413_v7  ;;  %v817_v7 = vld [vmem:[%s1181_s4 + $0x6] ss:$0 sm:$0xff] }
  0x2f   :  { %356 = vmatpush.msrb.mxu1 %v951_v32 }
  0x30   :  { %328 = vmatpush.msrb.mxu0 %v189_v62 }
  0x31   :  { %358 = vmatpush.msrb.mxu1 %v962_v36 }
  0x32   :  { %332 = vmatpush.msrb.mxu0 %v195_v3 }
  0x33   :  { %360 = vmatpush.msrb.mxu1 %v977_v41 }
  0x34   :  { %336 = vmatpush.msrb.mxu0 %v201_v17 }
  0x35   :  { %362 = vmatpush.msrb.mxu1 %v994_v47  ;;  %v374_v47 = vld [vmem:[%s1182_s2] sm:$0xff]  ;;  %s854_s2 = smov 96  }
  0x36   :  { %399 = vmatpush.msrb.mxu2 %v374_v47  ;;  %v795_v3 = vpack.i.bf16 %v374_v47, %v375_v46 }
  0x37   :  { %364 = vmatpush.msrb.mxu1 %v1002_v52 }
  0x39   :  { %366 = vmatpush.msrb.mxu1 %v121_v58 }
  0x3b   :  { %368 = vmatpush.msrb.mxu1 %v123_v0  ;;  %v790_v0 = vpack.i.bf16 %v376_v45, %v377_v44 }
  0x3d   :  { %791 = vrot.lane.b32.xlu2 %v790_v0, %s854_s2 }
  0x45   :  { %796 = vrot.lane.b32.xlu2 %v795_v3, %s854_s2 }
  0x5e   :  { %v53_v11 = vpop.permute.xlu2 %52 }
  0x5f   :  { %vm54_vm5 = vcmp.eq.s32.totalorder %v22_v9, %v53_v11 }
  0x60   :  { %v756_v29 = vsel %vm54_vm5, 1.0, %v852_v16 }
  0x67   :  { %v60_v13 = vpop.permute.xlu2 %59 }
  0x68   :  { %vm61_vm6 = vcmp.eq.s32.totalorder %v22_v9, %v60_v13 }
  0x69   :  { %v757_v32 = vsel %vm61_vm6, 1.0, %v852_v16 }
  0x70   :  { %v74_v27 = vpop.permute.xlu2 %73 }
  0x71   :  { %vm75_vm7 = vcmp.eq.s32.totalorder %v22_v9, %v74_v27 }
  0x72   :  { %v759_v35 = vsel %vm75_vm7, 1.0, %v852_v16  ;;  %vm605_vm7 = vcmask 785408  }
  0x74   :  { %v25_v10 = vpop.permute.xlu0 %24  ;;  %v39_v12 = vpop.permute.xlu1 %38 }
  0x75   :  { %vm26_vm1 = vcmp.eq.s32.totalorder %v22_v9, %v25_v10  ;;  %vm40_vm2 = vcmp.eq.s32.totalorder %v22_v9, %v39_v12 }
  0x76   :  { %v752_v21 = vsel %vm26_vm1, 1.0, %v852_v16  ;;  %v754_v24 = vsel %vm40_vm2, 1.0, %v852_v16  ;;  %vm554_vm2 = vcmask 523264  }
  0x7d   :  { %v32_v14 = vpop.permute.xlu0 %31  ;;  %v46_v15 = vpop.permute.xlu1 %45 }
  0x7e   :  { %vm33_vm3 = vcmp.eq.s32.totalorder %v22_v9, %v32_v14  ;;  %vm47_vm4 = vcmp.eq.s32.totalorder %v22_v9, %v46_v15 }
  0x7f   :  { %v753_v22 = vsel %vm33_vm3, 1.0, %v852_v16  ;;  %v755_v26 = vsel %vm47_vm4, 1.0, %v852_v16 }
  0x80   :  { %v36_v23 = vadd.f32 %v753_v22, %v752_v21 }
  0x82   :  { %v43_v25 = vadd.f32 %v754_v24, %v36_v23 }
  0x84   :  { %v50_v28 = vadd.f32 %v755_v26, %v43_v25 }
  0x86   :  { %v57_v30 = vadd.f32 %v756_v29, %v50_v28  ;;  %v67_v31 = vpop.permute.xlu1 %66  ;;  %v812_v28 = vld [vmem:[%s1181_s4 + $0x1] ss:$0 sm:$0xff] }
  0x87   :  { %vm68_vm8 = vcmp.eq.s32.totalorder %v22_v9, %v67_v31  ;;  %v813_v31 = vld [vmem:[%s1181_s4 + $0x2] ss:$0 sm:$0xff] }
  0x88   :  { %v64_v33 = vadd.f32 %v757_v32, %v57_v30  ;;  %v758_v34 = vsel %vm68_vm8, 1.0, %v852_v16  ;;  %vm634_vm8 = vcmask 130048  }
  0x8a   :  { %v71_v36 = vadd.f32 %v758_v34, %v64_v33 }
  0x8c   :  { %v78_v37 = vadd.f32 %v759_v35, %v71_v36  ;;  %v814_v35 = vld [vmem:[%s1181_s4 + $0x3] ss:$0 sm:$0xff] }
  0x8e   :  { %v92_v38 = vsel %vm90_vm9, %v78_v37, 0 }
  0x8f   :  { %v125_v39 = vand.u32 4294901760, %v92_v38 }
  0x91   :  { %206 = vmatmul.f32.vlgmr.msra.gmra.mxu1 %v125_v39  ;;  %v126_v40 = vsub.f32 %v92_v38, %v125_v39 }
  0x93   :  { %250 = vmatmul.f32.vlgmr.msra.gmra.mxu2 %v126_v40  ;;  %v127_v41 = vand.u32 4294901760, %v126_v40 }
  0x95   :  { %284 = vmatmul.f32.vlgmr.msra.gmra.mxu3 %v127_v41  ;;  %v128_v42 = vsub.f32 %v126_v40, %v127_v41 }
  0x97   :  { %v129_v43 = vand.u32 4294901760, %v128_v42  ;;  %v792_v5 = vpop.permute.xlu2 %791 }
  0x98   :  { %v793_v10 = vunpack.i.l.bf16 %v792_v5  ;;  %v794_v12 = vunpack.i.h.bf16 %v792_v5 }
  0x99   :  { %130 = vmatmul.f32.vlgmr.msra.gmra.mxu0 %v129_v43  ;;  %370 = vmatmul.f32.vlgmr.msrb.gmra.mxu1 %v125_v39 }
  0x9a   :  { %473 = vmatpush.msra.mxu2 %v793_v10 }
  0x9c   :  { %474 = vmatpush.msra.mxu2 %v794_v12 }
  0x9f   :  { %v797_v9 = vpop.permute.xlu2 %796 }
  0xa0   :  { %v799_v13 = vunpack.i.h.bf16 %v797_v9  ;;  %v798_v14 = vunpack.i.l.bf16 %v797_v9 }
  0xa1   :  { %338 = vmatmul.f32.vlgmr.msrb.gmra.mxu0 %v125_v39 }
  0xa2   :  { %475 = vmatpush.msra.mxu2 %v798_v14 }
  0xa4   :  { %476 = vmatpush.msra.mxu2 %v799_v13 }
 0x10e   :  { %v207_v48 = vpop.f32.mrf.mxu1 }
 0x116   :  { %v131_v49 = vpop.f32.mrf.mxu0  ;;  %v251_v51 = vpop.f32.mrf.mxu2 }
 0x117   :  { %v208_v50 = vadd.f32 %v207_v48, %v131_v49  ;;  %v371_v57 = vpop.f32.mrf.mxu1 }
 0x118   :  { %v285_v53 = vpop.f32.mrf.mxu3 }
 0x119   :  { %v252_v52 = vadd.f32 %v251_v51, %v208_v50 }
 0x11b   :  { %v286_v54 = vadd.f32 %v285_v53, %v252_v52 }
 0x11e   :  { %v339_v55 = vpop.f32.mrf.mxu0 }
 0x11f   :  { %v340_v56 = vadd.f32 %v339_v55, %v286_v54 }
 0x121   :  { %v1049_v58 = vadd.f32 %v371_v57, %v340_v56 }
 0x123   :  { %760 = vmatmul.msk.f32.vlgmr.msrb.gmra.mxu2 %vm380_vm10, %v1049_v58 }
 0x1a6   :  { %v401_v60 = vpop.f32.mrf.mxu2 }
 0x1a7   :  { %v402_v61 = vadd.f32 %v811_v59, %v401_v60  ;;  %v815_v60 = vld [vmem:[%s1181_s4 + $0x4] ss:$0 sm:$0xff] }
 0x1a9   :  { %v406_v62 = vsel %vm380_vm10, %v402_v61, 0.0 }
 0x1aa   :  { %407 = vadd.xlane.f32.xlu0 %v406_v62 }
 0x21d   :  { %v408_v17 = vpop.xlane.xlu0 %407 }
 0x21e   :  { %v416_v18 = vmul.f32 %v415_v8, %v408_v17 }
 0x220   :  { %v417_v19 = vsub.f32 %v402_v61, %v416_v18  ;;  %v856_v18 = vmov 64.0  }
 0x222   :  { %v418_v20 = vmul.f32 %v417_v19, %v417_v19 }
 0x224   :  { %v419_v11 = vsel %vm380_vm10, %v418_v20, 0.0 }
 0x225   :  { %420 = vadd.xlane.f32.xlu1 %v419_v11 }
 0x23e   :  { %801 = vrot.lane.b32.xlu1 %v790_v0, %s855_s30 }
 0x298   :  { %v421_v15 = vpop.xlane.xlu1 %420 }
 0x299   :  { %v422_v16 = vmul.f32 %v421_v15, %v415_v8 }
 0x29b   :  { %v423_v21 = vadd.f32 1e-05, %v422_v16 }
 0x29d   :  { %830 = vrsqrt.f32 %v423_v21  ;;  %vm430_vm13 = vweird.f32 %v423_v21 }
 0x2a3   :  { %v831_v22 = vpop.eup %830 }
 0x2a4   :  { %v425_v23 = vmul.f32 %v831_v22, %v423_v21  ;;  %vm431_vm12 = vweird.f32 %v831_v22  ;;  %v604_v21 = vld [vmem:[%s1183_s3 + $0x58] sm:$0xff] }
 0x2a5   :  { %vm432_vm14 = vmor %vm430_vm13, %vm431_vm12  ;;  %613 = vmatpush.msrb.mxu3 %v604_v21 }
 0x2a6   :  { %v426_v24 = vmul.f32 %v831_v22, %v425_v23  ;;  %v602_v23 = vld [vmem:[%s1183_s3 + $0x48] sm:$0xff] }
 0x2a8   :  { %v427_v25 = vmul.f32 0.5, %v426_v24  ;;  %v601_v24 = vld [vmem:[%s1183_s3 + $0x40] sm:$0xff] }
 0x2aa   :  { %v428_v26 = vsub.f32 1.5, %v427_v25  ;;  %v600_v25 = vld [vmem:[%s1183_s3 + $0x38] sm:$0xff] }
 0x2ac   :  { %v429_v27 = vmul.f32 %v831_v22, %v428_v26  ;;  %v599_v26 = vld [vmem:[%s1183_s3 + $0x30] sm:$0xff] }
 0x2ae   :  { %v433_v29 = vsel %vm432_vm14, %v831_v22, %v429_v27  ;;  %v603_v22 = vld [vmem:[%s1183_s3 + $0x50] sm:$0xff]  ;;  %v598_v27 = vld [vmem:[%s1183_s3 + $0x28] sm:$0xff] }
 0x2af   :  { %v434_v30 = vmul.f32 %v433_v29, %v417_v19  ;;  %614 = vmatpush.msrb.mxu3 %v603_v22  ;;  %v596_v29 = vld [vmem:[%s1183_s3 + $0x18] sm:$0xff] }
 0x2b0   :  { %v802_v44 = vpop.permute.xlu1 %801 }
 0x2b1   :  { %v436_v32 = vmul.f32 %v812_v28, %v434_v30  ;;  %v804_v45 = vunpack.i.h.bf16 %v802_v44  ;;  %v803_v46 = vunpack.i.l.bf16 %v802_v44  ;;  %615 = vmatpush.msrb.mxu3 %v602_v23  ;;  %v597_v28 = vld [vmem:[%s1183_s3 + $0x20] sm:$0xff]  ;;  %v595_v30 = vld [vmem:[%s1183_s3 + $0x10] sm:$0xff] }
 0x2b3   :  { %v438_v33 = vadd.f32 %v813_v31, %v436_v32  ;;  %544 = vmatpush.msrb.mxu2 %v803_v46  ;;  %616 = vmatpush.msrb.mxu3 %v601_v24  ;;  %v594_v31 = vld [vmem:[%s1183_s3 + $0x8] sm:$0xff]  ;;  %v593_v32 = vld [vmem:[%s1183_s3] sm:$0xff] }
 0x2b4   :  { %v819_v46 = vld [vmem:[%s1181_s4 + $0x8] ss:$0 sm:$0xff] }
 0x2b5   :  { %v439_v34 = vmax.f32 %v438_v33, 0.0  ;;  %545 = vmatpush.msrb.mxu2 %v804_v45  ;;  %617 = vmatpush.msrb.mxu3 %v600_v25 }
 0x2b7   :  { %761 = vmatmul.msk.f32.vlgmr.msra.gmra.mxu2 %vm380_vm10, %v439_v34  ;;  %618 = vmatpush.msrb.mxu3 %v599_v26  ;;  %v820_v34 = vld [vmem:[%s1181_s4 + $0xc] ss:$0 sm:$0xff] }
 0x2b9   :  { %619 = vmatpush.msrb.mxu3 %v598_v27 }
 0x2bb   :  { %620 = vmatpush.msrb.mxu3 %v597_v28 }
 0x2bd   :  { %621 = vmatpush.msrb.mxu3 %v596_v29 }
 0x2bf   :  { %622 = vmatpush.msrb.mxu3 %v595_v30 }
 0x2c1   :  { %623 = vmatpush.msrb.mxu3 %v594_v31 }
 0x2c3   :  { %624 = vmatpush.msrb.mxu3 %v593_v32 }
 0x33a   :  { %v478_v36 = vpop.f32.mrf.mxu2 }
 0x33b   :  { %v479_v37 = vadd.f32 %v814_v35, %v478_v36 }
 0x33d   :  { %v483_v38 = vsel %vm380_vm10, %v479_v37, 0.0 }
 0x33e   :  { %484 = vadd.xlane.f32.xlu2 %v483_v38 }
 0x356   :  { %511 = vrot.lane.b32.xlu2 %v1049_v58, %s854_s2 }
 0x3b1   :  { %v485_v39 = vpop.xlane.xlu2 %484 }
 0x3b2   :  { %v486_v40 = vmul.f32 %v485_v39, %v415_v8 }
 0x3b4   :  { %v487_v41 = vsub.f32 %v479_v37, %v486_v40 }
 0x3b6   :  { %v488_v42 = vmul.f32 %v487_v41, %v487_v41 }
 0x3b8   :  { %v489_v43 = vsel %vm380_vm10, %v488_v42, 0.0 }
 0x3b9   :  { %490 = vadd.xlane.f32.xlu0 %v489_v43  ;;  %v512_v4 = vpop.permute.xlu2 %511  ;;  %v818_v43 = vld [vmem:[%s1181_s4 + $0x7] ss:$0 sm:$0xff] }
 0x3cd   :  { %806 = vrot.lane.b32.xlu0 %v795_v3, %s855_s30 }
 0x42c   :  { %v491_v47 = vpop.xlane.xlu0 %490 }
 0x42d   :  { %v492_v48 = vmul.f32 %v491_v47, %v415_v8 }
 0x42f   :  { %v493_v49 = vadd.f32 1e-05, %v492_v48 }
 0x431   :  { %832 = vrsqrt.f32 %v493_v49  ;;  %vm500_vm0 = vweird.f32 %v493_v49 }
 0x432   :  { %834 = vrcp.f32 %v856_v18  ;;  %v822_v18 = vld [vmem:[%s1181_s4 + $0xe] ss:$0 sm:$0xff] }
 0x437   :  { %v833_v50 = vpop.eup %832 }
 0x438   :  { %v495_v51 = vmul.f32 %v833_v50, %v493_v49  ;;  %vm501_vm15 = vweird.f32 %v833_v50  ;;  %v835_v19 = vpop.eup %834 }
 0x439   :  { %vm502_vm1 = vmor %vm500_vm0, %vm501_vm15  ;;  %v559_v20 = vmul.f32 64.0, %v835_v19  ;;  %vm563_vm3 = vweird.f32 %v835_v19 }
 0x43a   :  { %v496_v52 = vmul.f32 %v833_v50, %v495_v51 }
 0x43b   :  { %v560_v11 = vsub.f32 1.0, %v559_v20 }
 0x43c   :  { %v497_v53 = vmul.f32 0.5, %v496_v52  ;;  %v821_v52 = vld [vmem:[%s1181_s4 + $0x9] ss:$0 sm:$0xff] }
 0x43d   :  { %v561_v5 = vmul.f32 %v835_v19, %v560_v11 }
 0x43e   :  { %v498_v54 = vsub.f32 1.5, %v497_v53 }
 0x43f   :  { %v807_v55 = vpop.permute.xlu0 %806  ;;  %v562_v10 = vadd.f32 %v835_v19, %v561_v5 }
 0x440   :  { %v499_v56 = vmul.f32 %v833_v50, %v498_v54  ;;  %v809_v57 = vunpack.i.h.bf16 %v807_v55  ;;  %v808_v59 = vunpack.i.l.bf16 %v807_v55 }
 0x441   :  { %v564_v12 = vsel %vm563_vm3, %v835_v19, %v562_v10 }
 0x442   :  { %v503_v61 = vsel %vm502_vm1, %v833_v50, %v499_v56  ;;  %546 = vmatpush.msrb.mxu2 %v808_v59  ;;  %vm743_vm1 = vcmask 392192  }
 0x443   :  { %v504_v62 = vmul.f32 %v503_v61, %v487_v41  ;;  %v859_v61 = vmov 16.0  }
 0x444   :  { %547 = vmatpush.msrb.mxu2 %v809_v57 }
 0x445   :  { %v506_v0 = vmul.f32 %v815_v60, %v504_v62 }
 0x447   :  { %v508_v1 = vadd.f32 %v816_v63, %v506_v0 }
 0x449   :  { %v1083_v2 = vadd.f32 %v508_v1, %v1049_v58 }
 0x44b   :  { %v510_v3 = vmax.f32 %v1083_v2, 0.0 }
 0x44d   :  { %v514_v6 = vadd.f32 %v512_v4, %v510_v3 }
 0x44f   :  { %589 = vrot.lane.b32.xlu2 %v514_v6, %s855_s30  ;;  %762 = vmatmul.msk.f32.vlgmr.msrb.gmra.mxu2 %vm380_vm10, %v514_v6 }
 0x457   :  { %671 = vrot.lane.b32.xlu2 %v820_v34, %s857_s10 }
 0x4a9   :  { %v590_v50 = vpop.permute.xlu2 %589 }
 0x4b1   :  { %v672_v53 = vpop.permute.xlu2 %671 }
 0x4d2   :  { %v549_v8 = vpop.f32.mrf.mxu2 }
 0x4d3   :  { %v550_v17 = vadd.f32 %v817_v7, %v549_v8 }
 0x4d5   :  { %v555_v58 = vsel %vm554_vm2, %v550_v17, 0.0 }
 0x4d6   :  { %556 = vadd.xlane.f32.xlu1 %v555_v58 }
 0x549   :  { %v557_v9 = vpop.xlane.xlu1 %556 }
 0x54a   :  { %v565_v13 = vmul.f32 %v564_v12, %v557_v9 }
 0x54c   :  { %v566_v14 = vsub.f32 %v550_v17, %v565_v13  ;;  %v823_v13 = vld [vmem:[%s1181_s4 + $0xd] ss:$0 sm:$0xff] }
 0x54e   :  { %v567_v15 = vmul.f32 %v566_v14, %v566_v14 }
 0x550   :  { %v568_v16 = vsel %vm554_vm2, %v567_v15, 0.0 }
 0x551   :  { %569 = vadd.xlane.f32.xlu0 %v568_v16 }
 0x5c4   :  { %v570_v33 = vpop.xlane.xlu0 %569 }
 0x5c5   :  { %v571_v35 = vmul.f32 %v570_v33, %v564_v12 }
 0x5c7   :  { %v572_v36 = vadd.f32 1e-05, %v571_v35 }
 0x5c9   :  { %836 = vrsqrt.f32 %v572_v36  ;;  %vm579_vm5 = vweird.f32 %v572_v36 }
 0x5ca   :  { %838 = vrcp.f32 %v859_v61 }
 0x5cf   :  { %v837_v37 = vpop.eup %836 }
 0x5d0   :  { %v574_v38 = vmul.f32 %v837_v37, %v572_v36  ;;  %vm580_vm4 = vweird.f32 %v837_v37  ;;  %v839_v62 = vpop.eup %838 }
 0x5d1   :  { %vm581_vm6 = vmor %vm579_vm5, %vm580_vm4  ;;  %v639_v63 = vmul.f32 16.0, %v839_v62  ;;  %vm643_vm9 = vweird.f32 %v839_v62 }
 0x5d2   :  { %v575_v39 = vmul.f32 %v837_v37, %v574_v38 }
 0x5d3   :  { %v640_v0 = vsub.f32 1.0, %v639_v63 }
 0x5d4   :  { %v576_v40 = vmul.f32 0.5, %v575_v39 }
 0x5d5   :  { %v641_v1 = vmul.f32 %v839_v62, %v640_v0 }
 0x5d6   :  { %v577_v41 = vsub.f32 1.5, %v576_v40 }
 0x5d7   :  { %v642_v4 = vadd.f32 %v839_v62, %v641_v1 }
 0x5d8   :  { %v578_v42 = vmul.f32 %v837_v37, %v577_v41 }
 0x5d9   :  { %v644_v6 = vsel %vm643_vm9, %v839_v62, %v642_v4 }
 0x5da   :  { %v582_v44 = vsel %vm581_vm6, %v837_v37, %v578_v42 }
 0x5db   :  { %v583_v45 = vmul.f32 %v582_v44, %v566_v14  ;;  %v824_v44 = vld [vmem:[%s1181_s4 + $0xa] ss:$0 sm:$0xff] }
 0x5dd   :  { %v585_v47 = vmul.f32 %v818_v43, %v583_v45 }
 0x5df   :  { %v587_v48 = vadd.f32 %v819_v46, %v585_v47  ;;  %v825_v46 = vld [vmem:[%s1181_s4 + $0xb] ss:$0 sm:$0xff] }
 0x5e1   :  { %v588_v49 = vmax.f32 %v587_v48, 0.0 }
 0x5e3   :  { %v592_v51 = vsel %vm554_vm2, %v588_v49, %v590_v50  ;;  %v826_v50 = vld [vmem:[%s1181_s4 + $0xf] ss:$0 sm:$0xff]  ;;  %vm745_vm2 = vcmask 400384  }
 0x5e4   :  { %763 = vmatmul.msk.f32.vlgmr.msrb.gmra.mxu3 %vm605_vm7, %v592_v51 }
 0x667   :  { %v626_v54 = vpop.f32.mrf.mxu3 }
 0x668   :  { %v631_v55 = vadd.f32 %v821_v52, %v626_v54  ;;  %v674_v56 = vadd.f32 %v672_v53, %v626_v54  ;;  %v827_v54 = vld [vmem:[%s1181_s4 + $0x10] ss:$0 sm:$0xff] }
 0x66a   :  { %678 = vrot.lane.b32.xlu2 %v674_v56, %s858_s1  ;;  %v635_v57 = vsel %vm634_vm8, %v631_v55, 0.0 }
 0x66b   :  { %636 = vadd.xlane.f32.xlu0 %v635_v57 }
 0x6c4   :  { %v679_v59 = vpop.permute.xlu2 %678 }
 0x6c5   :  { %v681_v60 = vsel %vm634_vm8, %v679_v59, 0.0 }
 0x6c6   :  { %682 = vadd.xlane.f32.xlu2 %v681_v60 }
 0x6de   :  { %v637_v19 = vpop.xlane.xlu0 %636 }
 0x6df   :  { %v645_v20 = vmul.f32 %v644_v6, %v637_v19 }
 0x6e1   :  { %v646_v11 = vsub.f32 %v631_v55, %v645_v20 }
 0x6e3   :  { %v647_v5 = vmul.f32 %v646_v11, %v646_v11 }
 0x6e5   :  { %v648_v10 = vsel %vm634_vm8, %v647_v5, 0.0 }
 0x739   :  { %v683_v7 = vpop.xlane.xlu2 %682 }
 0x73a   :  { %v684_v8 = vmul.f32 %v683_v7, %v644_v6 }
 0x73c   :  { %v685_v17 = vsub.f32 %v674_v56, %v684_v8 }
 0x73e   :  { %v686_v58 = vmul.f32 %v685_v17, %v685_v17 }
 0x740   :  { %688 = vrot.lane.b32.xlu1 %v686_v58, %s858_s1 }
 0x748   :  { %715 = vrot.lane.b32.xlu1 %v822_v18, %s857_s10 }
 0x772   :  { %649 = vadd.xlane.f32.xlu1 %v648_v10 }
 0x7b2   :  { %v689_v12 = vpop.permute.xlu1 %688 }
 0x7b3   :  { %v691_v9 = vsel %vm634_vm8, %v689_v12, 0.0 }
 0x7b4   :  { %692 = vadd.xlane.f32.xlu0 %v691_v9 }
 0x7ba   :  { %v716_v31 = vpop.permute.xlu1 %715 }
 0x7c8   :  { %709 = vrot.lane.b32.xlu0 %v823_v13, %s857_s10 }
 0x7e5   :  { %v650_v33 = vpop.xlane.xlu1 %649 }
 0x7e6   :  { %v651_v34 = vmul.f32 %v650_v33, %v644_v6 }
 0x7e8   :  { %v652_v35 = vadd.f32 1e-05, %v651_v34 }
 0x7ea   :  { %vm659_vm15 = vweird.f32 %v652_v35 }
 0x827   :  { %v693_v14 = vpop.xlane.xlu0 %692 }
 0x828   :  { %v694_v15 = vmul.f32 %v693_v14, %v644_v6 }
 0x82a   :  { %v695_v16 = vadd.f32 1e-05, %v694_v15 }
 0x82c   :  { %840 = vrsqrt.f32 %v695_v16  ;;  %vm702_vm12 = vweird.f32 %v695_v16 }
 0x82d   :  { %842 = vrsqrt.f32 %v652_v35 }
 0x832   :  { %v841_v21 = vpop.eup %840 }
 0x833   :  { %v697_v22 = vmul.f32 %v841_v21, %v695_v16  ;;  %vm703_vm11 = vweird.f32 %v841_v21  ;;  %v843_v36 = vpop.eup %842 }
 0x834   :  { %vm704_vm13 = vmor %vm702_vm12, %vm703_vm11  ;;  %v654_v37 = vmul.f32 %v843_v36, %v652_v35  ;;  %vm660_vm14 = vweird.f32 %v843_v36 }
 0x835   :  { %v698_v23 = vmul.f32 %v841_v21, %v697_v22  ;;  %vm661_vm0 = vmor %vm659_vm15, %vm660_vm14 }
 0x836   :  { %v655_v38 = vmul.f32 %v843_v36, %v654_v37 }
 0x837   :  { %v699_v24 = vmul.f32 0.5, %v698_v23 }
 0x838   :  { %v656_v39 = vmul.f32 0.5, %v655_v38 }
 0x839   :  { %v700_v25 = vsub.f32 1.5, %v699_v24 }
 0x83a   :  { %v710_v28 = vpop.permute.xlu0 %709  ;;  %v657_v40 = vsub.f32 1.5, %v656_v39 }
 0x83b   :  { %v701_v26 = vmul.f32 %v841_v21, %v700_v25 }
 0x83c   :  { %v658_v41 = vmul.f32 %v843_v36, %v657_v40 }
 0x83d   :  { %v705_v27 = vsel %vm704_vm13, %v841_v21, %v701_v26 }
 0x83e   :  { %v706_v29 = vmul.f32 %v705_v27, %v685_v17  ;;  %v662_v42 = vsel %vm661_vm0, %v843_v36, %v658_v41 }
 0x83f   :  { %v663_v43 = vmul.f32 %v662_v42, %v646_v11 }
 0x840   :  { %v712_v30 = vmul.f32 %v710_v28, %v706_v29 }
 0x841   :  { %v665_v45 = vmul.f32 %v824_v44, %v663_v43 }
 0x842   :  { %v718_v32 = vadd.f32 %v716_v31, %v712_v30 }
 0x843   :  { %v667_v47 = vadd.f32 %v825_v46, %v665_v45 }
 0x844   :  { %720 = vrot.lane.b32.xlu2 %v718_v32, %s858_s1 }
 0x89e   :  { %v721_v48 = vpop.permute.xlu2 %720 }
 0x89f   :  { %v723_v49 = vadd.f32 %v721_v48, %v667_v47 }
 0x8a1   :  { %v724_v51 = vmax.f32 %v723_v49, 0.0 }
 0x8a3   :  { %735 = vrot.lane.b32.xlu2 %v724_v51, %s860_s25  ;;  %v728_v52 = vmul.f32 %v826_v50, %v724_v51 }
 0x8a5   :  { %v729_v53 = vsel %vm634_vm8, %v728_v52, 0.0 }
 0x8a6   :  { %730 = vadd.xlane.f32.xlu0 %v729_v53 }
 0x8fd   :  { %v736_v57 = vpop.permute.xlu2 %735 }
 0x8fe   :  { %v742_v59 = vsel %vm380_vm10, %v510_v3, %v736_v57 }
 0x919   :  { %v731_v55 = vpop.xlane.xlu0 %730 }
 0x91a   :  { %v733_v56 = vadd.f32 %v827_v54, %v731_v55 }
 0x91c   :  { %739 = vrot.lane.b32.xlu2 %v733_v56, %s861_s27 }
 0x976   :  { %v740_v60 = vpop.permute.xlu2 %739 }
 0x977   :  { %v744_v61 = vsel %vm743_vm1, %v742_v59, %v740_v60 }
 0x978   :  { %v746_v62 = vsel %vm745_vm2, %v744_v61, 0.0 }
 0x979   :  { %747 = vst [vmem:[%s1184_s5] sm:$0xff] %v746_v62 }

</bundles_post_ra>
